<compile_context>
chip_gen: v7x
topology: tpu7x:2x2x1
jax: 0.10.0
libtpu: 0.0.40
codegen_flags: <defaults>
</compile_context>

<pallas_src>
import functools

import jax
import jax.numpy as jnp
from jax.experimental import pallas as pl
from jax.experimental.pallas import tpu as pltpu

_LANES = 128
# Per pipeline buffer budget (x2 for double buffering).  12 MiB => 8192 rows
# of 128 f32 lanes per chunk, matching the HBM-roofline sizing from review.
_DEFAULT_MAX_BLOCK_BYTES = 12 * 1024 * 1024


def _round_up(x, m):
    return (x + m - 1) // m * m


def _largest_divisor_leq(n, cap):
    cap = max(1, min(n, cap))
    for d in range(cap, 0, -1):
        if n % d == 0:
            return d
    return 1


def _partial_sum_kernel(x_ref, o_ref, *, rows_valid, chunk_rows,
                        chunks_per_split, sub, need_mask):
    """Accumulate lane-parallel per-channel partial sums.

    x_ref: (TB, 3, chunk_rows, L) pixel chunk (native dtype).
    o_ref: (TB, 1, 3, sub, L) f32 accumulator, resident across the chunk axis.
    """
    k = pl.program_id(2)

    @pl.when(k == 0)
    def _():
        o_ref[...] = jnp.zeros_like(o_ref)

    x = x_ref[...].astype(jnp.float32)        # upcast only in VMEM (bf16 DMA ok)

    if need_mask:
        # Partial final block / phantom split chunks: OOB rows are unspecified,
        # so zero them BEFORE summing.
        s = pl.program_id(1)
        start = (s * chunks_per_split + k) * chunk_rows
        row = jax.lax.broadcasted_iota(jnp.int32, x.shape, 2)
        x = jnp.where(row < (rows_valid - start), x, 0.0)

    tb, c, cr, lanes = x.shape
    if sub > 1:
        # Row-group reduce: pure VPU vreg adds; keep 8 sublanes unreduced so no
        # per-step cross-sublane (XLU) collapse is needed.
        part = jnp.sum(x.reshape(tb, c, cr // sub, sub, lanes), axis=2)
    else:
        part = jnp.sum(x, axis=2, keepdims=True)

    o_ref[...] += part[:, None]               # (TB, 1, 3, sub, L)


def l_color(x, *, max_block_bytes=_DEFAULT_MAX_BLOCK_BYTES):
    """Zero-DCE color-constancy loss. x: (B, 3, H, W). Returns (B, 1, 1, 1)."""
    b, c, h, w = x.shape
    assert c == 3, "L_color expects 3 (RGB) channels"
    hw = h * w

    # Choose a lane-dense (rows, 128) view when it is a free reshape; otherwise
    # stream the natural (H, W) layout directly -- never jnp.pad (no HBM copy).
    if hw % _LANES == 0:
        rows, lanes = hw // _LANES, _LANES
        x_view = x.reshape(b, c, rows, lanes)
    else:
        rows, lanes = h, w
        x_view = x

    itemsize = jnp.dtype(x.dtype).itemsize
    sublane = max(8, 32 // itemsize)           # 8 f32 / 16 bf16 / 32 int8
    lanes_padded = _round_up(lanes, _LANES)    # VMEM lane padding for budgeting
    bytes_per_row = 3 * lanes_padded * itemsize

    # Chunk the row (pixel) axis; biggest chunk that fits the per-buffer budget.
    max_rows = max(sublane, (max_block_bytes // bytes_per_row) // sublane * sublane)
    if rows <= max_rows:
        chunk_rows, n_chunks = rows, 1         # full-dim block (any row count ok)
    else:
        chunk_rows, n_chunks = max_rows, pl.cdiv(rows, max_rows)

    sub = 8 if chunk_rows % 8 == 0 else 1      # sublane-dense accumulator depth

    # Small-image regime: pack several images per grid step to amortize the
    # fixed per-step overhead (in + out bytes per image kept under budget).
    if n_chunks == 1:
        per_image = (3 * chunk_rows * lanes_padded * itemsize
                     + 3 * sub * lanes_padded * 4)
        tb = _largest_divisor_leq(b, max(1, max_block_bytes // per_image))
    else:
        tb = 1
    groups = b // tb

    # When batch alone can't occupy both TensorCores (v7x megacore), split the
    # chunk range two ways; each split owns its own accumulator slab.
    nsplit = 2 if (groups == 1 and n_chunks >= 2) else 1
    kc = pl.cdiv(n_chunks, nsplit)
    need_mask = (nsplit * kc * chunk_rows) != rows

    kernel = functools.partial(
        _partial_sum_kernel,
        rows_valid=rows, chunk_rows=chunk_rows, chunks_per_split=kc,
        sub=sub, need_mask=need_mask)

    def in_map(g, s, k):
        # Clamp phantom chunk indices (odd split); their rows are fully masked.
        return (g, 0, jnp.minimum(s * kc + k, n_chunks - 1), 0)

    def out_map(g, s, k):
        return (g, s, 0, 0, 0)

    partial_sums = pl.pallas_call(
        kernel,
        out_shape=jax.ShapeDtypeStruct((b, nsplit, 3, sub, lanes), jnp.float32),
        grid_spec=pltpu.PrefetchScalarGridSpec(
            num_scalar_prefetch=0,
            grid=(groups, nsplit, kc),
            in_specs=[pl.BlockSpec((tb, 3, chunk_rows, lanes), in_map)],
            out_specs=pl.BlockSpec((tb, 1, 3, sub, lanes), out_map),
        ),
        compiler_params=pltpu.CompilerParams(
            dimension_semantics=("parallel", "parallel", "arbitrary"),
            vmem_limit_bytes=48 * 1024 * 1024,
        ),
    )(x_view)

    # O(1) tail in plain JAX: collapse split/sublane/lane axes, then diffs+sqrt.
    sums = jnp.sum(partial_sums, axis=(1, 3, 4))           # (B, 3)
    means = sums * (1.0 / float(hw))
    mr, mg, mb = means[:, 0], means[:, 1], means[:, 2]
    drg = (mr - mg) ** 2
    drb = (mr - mb) ** 2
    dgb = (mb - mg) ** 2
    k = jnp.sqrt(drg ** 2 + drb ** 2 + dgb ** 2)
    return k.reshape(b, 1, 1, 1).astype(x.dtype)


def _l_color_ref(x):
    """Pure-JAX reference mirroring the PyTorch forward (f32 math)."""
    xf = x.astype(jnp.float32)
    mean_rgb = jnp.mean(xf, axis=(2, 3), keepdims=True)     # (B, 3, 1, 1)
    mr = mean_rgb[:, 0:1]
    mg = mean_rgb[:, 1:2]
    mb = mean_rgb[:, 2:3]
    drg = (mr - mg) ** 2
    drb = (mr - mb) ** 2
    dgb = (mb - mg) ** 2
    return jnp.sqrt(drg**2 + drb**2 + dgb**2)               # (B, 1, 1, 1)


if __name__ == "__main__":
    key = jax.random.PRNGKey(0)

    # Primary small case (RGB images, lane-dense path, batch packing).
    x = jax.random.uniform(key, (2, 3, 16, 16), dtype=jnp.float32)
    out = jax.block_until_ready(l_color(x))
    ref = _l_color_ref(x)
    assert out.shape == (2, 1, 1, 1), out.shape
    assert jnp.allclose(out, ref, atol=1e-6, rtol=1e-5), (out, ref)

    # Non-128-aligned H*W -> natural (H, W) streaming path (no padding copy).
    x2 = jax.random.uniform(jax.random.PRNGKey(1), (2, 3, 17, 19),
                            dtype=jnp.float32)
    out2 = jax.block_until_ready(l_color(x2))
    assert jnp.allclose(out2, _l_color_ref(x2), atol=1e-6, rtol=1e-5)

    # B == 1 with multiple chunks: exercises the two-way core split, the
    # clamped/phantom chunk index and the in-kernel row mask.
    x3 = jax.random.uniform(jax.random.PRNGKey(2), (1, 3, 12, 256),
                            dtype=jnp.float32)
    out3 = jax.block_until_ready(l_color(x3, max_block_bytes=3 * 16 * 128 * 4))
    assert jnp.allclose(out3, _l_color_ref(x3), atol=1e-6, rtol=1e-5)

    # bf16 input: DMA stays bf16, accumulation is f32.
    x4 = jax.random.uniform(jax.random.PRNGKey(3), (2, 3, 16, 16),
                            dtype=jnp.bfloat16)
    out4 = jax.block_until_ready(l_color(x4))
    assert jnp.allclose(out4.astype(jnp.float32), _l_color_ref(x4),
                        rtol=5e-2, atol=1e-5)

    print("KERNEL_OK")
</pallas_src>

<mosaic_0001>
module attributes {stable_mosaic.version = 11 : i64} {
  func.func @_partial_sum_kernel(%arg0: i32, %arg1: i32, %arg2: i32, %arg3: memref<2x3x2x128xf32, #tpu.memory_space<vmem>>, %arg4: memref<2x1x3x1x128xf32, #tpu.memory_space<vmem>>) attributes {dimension_semantics = [#tpu.dimension_semantics<parallel>, #tpu.dimension_semantics<parallel>, #tpu.dimension_semantics<arbitrary>], iteration_bounds = array<i64: 1, 1, 1>, scalar_prefetch = 0 : i64, scratch_operands = 0 : i64, tpu.core_type = #tpu.core_type<tc>, window_params = [{transform_indices = @transform_0, window_bounds = array<i64: 2, 3, 2, 128>}, {transform_indices = @transform_1, window_bounds = array<i64: 2, 1, 3, 1, 128>}]} {
    %c0_i32 = arith.constant 0 : i32
    %0 = arith.cmpi eq, %arg2, %c0_i32 : i32
    %1 = arith.extui %0 : i1 to i32
    %c0_i32_0 = arith.constant 0 : i32
    %2 = arith.cmpi ne, %1, %c0_i32_0 : i32
    scf.if %2 {
      %cst_14 = arith.constant 0.000000e+00 : f32
      %10 = vector.broadcast %cst_14 : f32 to vector<2x1x3x1x128xf32>
      %c0_15 = arith.constant 0 : index
      %c0_16 = arith.constant 0 : index
      %c0_17 = arith.constant 0 : index
      %c0_18 = arith.constant 0 : index
      %c0_19 = arith.constant 0 : index
      %11 = vector.load %arg4[%c0_15, %c0_16, %c0_17, %c0_18, %c0_19] : memref<2x1x3x1x128xf32, #tpu.memory_space<vmem>>, vector<2x1x3x1x128xf32>
      tpu.vector_store %arg4[%c0_15, %c0_16, %c0_17, %c0_18, %c0_19], %10 {strides = array<i32>} : memref<2x1x3x1x128xf32, #tpu.memory_space<vmem>>, vector<2x1x3x1x128xf32>,
    } else {
    }
    %c0 = arith.constant 0 : index
    %c0_1 = arith.constant 0 : index
    %c0_2 = arith.constant 0 : index
    %c0_3 = arith.constant 0 : index
    %3 = vector.load %arg3[%c0, %c0_1, %c0_2, %c0_3] : memref<2x3x2x128xf32, #tpu.memory_space<vmem>>, vector<2x3x2x128xf32>
    %cst = arith.constant dense<0.000000e+00> : vector<2x3x128xf32>
    %4 = vector.multi_reduction <add>, %3, %cst [2] : vector<2x3x2x128xf32> to vector<2x3x128xf32>
    %5 = vector.shape_cast %4 : vector<2x3x128xf32> to vector<2x3x1x128xf32>
    %c0_4 = arith.constant 0 : index
    %c0_5 = arith.constant 0 : index
    %c0_6 = arith.constant 0 : index
    %c0_7 = arith.constant 0 : index
    %c0_8 = arith.constant 0 : index
    %6 = vector.load %arg4[%c0_4, %c0_5, %c0_6, %c0_7, %c0_8] : memref<2x1x3x1x128xf32, #tpu.memory_space<vmem>>, vector<2x1x3x1x128xf32>
    %7 = vector.shape_cast %5 : vector<2x3x1x128xf32> to vector<2x1x3x1x128xf32>
    %8 = arith.addf %6, %7 : vector<2x1x3x1x128xf32>
    %c0_9 = arith.constant 0 : index
    %c0_10 = arith.constant 0 : index
    %c0_11 = arith.constant 0 : index
    %c0_12 = arith.constant 0 : index
    %c0_13 = arith.constant 0 : index
    %9 = vector.load %arg4[%c0_9, %c0_10, %c0_11, %c0_12, %c0_13] : memref<2x1x3x1x128xf32, #tpu.memory_space<vmem>>, vector<2x1x3x1x128xf32>
    tpu.vector_store %arg4[%c0_9, %c0_10, %c0_11, %c0_12, %c0_13], %8 {strides = array<i32>} : memref<2x1x3x1x128xf32, #tpu.memory_space<vmem>>, vector<2x1x3x1x128xf32>,
    return
  }
  func.func @transform_0(%arg0: i32, %arg1: i32, %arg2: i32) -> (i32, i32, i32, i32) {
    %c1_i32 = arith.constant 1 : i32
    %0 = arith.muli %arg1, %c1_i32 : i32
    %1 = arith.addi %0, %arg2 : i32
    %c0_i32 = arith.constant 0 : i32
    %2 = arith.minsi %1, %c0_i32 : i32
    %c0_i32_0 = arith.constant 0 : i32
    %c0_i32_1 = arith.constant 0 : i32
    %c0_i32_2 = arith.constant 0 : i32
    return %arg0, %c0_i32_0, %2, %c0_i32_1 : i32, i32, i32, i32
  }
  func.func @transform_1(%arg0: i32, %arg1: i32, %arg2: i32) -> (i32, i32, i32, i32, i32) {
    %c0_i32 = arith.constant 0 : i32
    %c0_i32_0 = arith.constant 0 : i32
    %c0_i32_1 = arith.constant 0 : i32
    %c0_i32_2 = arith.constant 0 : i32
    return %arg0, %arg1, %c0_i32, %c0_i32_0, %c0_i32_1 : i32, i32, i32, i32, i32
  }
}

</mosaic_0001>

<bundles_post_ra>
// kernel: tpu_custom_call.1
= control target key start
LH: loop header
LB: loop body
LE: loop exit
PB: predicated region body
PF: predicated region fallthrough
CT: control target
= control target key end

     0   :  { %6 = vsyncpa [#allocation3], 0  ;;  %s229_s0 = inlined_call_operand.hbm [shape: f32[2,3,2,128], index: 0, kind: input, shape index: {}]   ;;  %s230_s1 = inlined_call_operand.hbm [shape: f32[2,1,3,1,128], index: 1, kind: output, shape index: {}]  }
   0x1   :  { %7 = vsyncpa [#allocation4], 0  ;;  %s182_s6 = smov [#allocation2]   ;;  %s134_s10 = scalar_lea.hbm %s229_s0, 192 }
   0x2   :  { %s18_s7 = sshll.u32 %s182_s6, 4  ;;  %p135_p0 = scmp.ne.s32.totalorder %s229_s0, %s134_s10  ;;  %s19_s7 = int_to_ptr.vmem [resolvable:$true] %s18_s7 }
   0x3   :  { %p138_p1 = scmp.lt.u32.totalorder %s134_s10, %s229_s0 }
   0x5   :  { %p140_p2 = pnand %p138_p1, %p135_p0 }
   0x7   :  { %143 = shalt.err (!%p140_p2)
}
   0x8   :  { %s144_s15 = scalar_lea.vmem %s19_s7, 192  ;;  %p149_p4 = scmp.lt.s32.totalorder %s19_s7, %s19_s7 }
   0x9   :  { %p145_p3 = scmp.ne.s32.totalorder %s19_s7, %s144_s15  ;;  %p150_p5 = scmp.lt.s32.totalorder %s144_s15, %s144_s15 }
   0xb   :  { %p151_p6 = por %p150_p5, %p149_p4 }
   0xd   :  { %p152_p7 = pnand %p151_p6, %p145_p3 }
   0xf   :  { %155 = shalt.err (!%p152_p7)
}
  0x10   :  { %s183_s16 = smov 32   ;;  %s184_s17 = smov 2  }
  0x11   :  { %24 = dma.hbm_to_vmem [thread:$0]  %s229_s0, 192, %s19_s7, [#allocation3], %s183_s16, %s183_s16, %s184_s17  }
  0x12   :  { %178 = dma.done.wait [#allocation3], 192  }
  0x13   :  { %179 = vsyncadd [#allocation3], 4294967104  ;;  %v185_v0 = vmov 0.0   ;;  %vm47_vm0 = vcmask 1041408   ;;  %v41_v1 = vld [vmem:[#allocation2] sm:$0x3] }
  0x14   :  { %35 = vst [vmem:[#allocation5] sm:$0x1] %v185_v0  ;;  %36 = vst [vmem:[#allocation5 + $0x1] sm:$0x1] %v185_v0  ;;  %v42_v2 = vld [vmem:[#allocation2 + $0x2] sm:$0x3] }
  0x15   :  { %37 = vst [vmem:[#allocation5 + $0x2] sm:$0x1] %v185_v0  ;;  %38 = vst [vmem:[#allocation5 + $0x3] sm:$0x1] %v185_v0  ;;  %v43_v3 = vld [vmem:[#allocation2 + $0x4] sm:$0x3] }
  0x16   :  { %39 = vst [vmem:[#allocation5 + $0x4] sm:$0x1] %v185_v0  ;;  %40 = vst [vmem:[#allocation5 + $0x5] sm:$0x1] %v185_v0  ;;  %v48_v4 = vsel %vm47_vm0, %v41_v1, 0.0  ;;  %v55_v5 = vsel %vm47_vm0, %v42_v2, 0.0 }
  0x17   :  { %v49_v6 = vrot.slane %v48_v4, 4  ;;  %v56_v7 = vrot.slane %v55_v5, 4  ;;  %v62_v8 = vsel %vm47_vm0, %v43_v3, 0.0  ;;  %v44_v10 = vld [vmem:[#allocation2 + $0x6] sm:$0x3]  ;;  %s186_s0 = smov [#allocation5]  }
  0x18   :  { %v63_v9 = vrot.slane %v62_v8, 4  ;;  %v69_v13 = vsel %vm47_vm0, %v44_v10, 0.0  ;;  %v45_v14 = vld [vmem:[#allocation2 + $0x8] sm:$0x3]  ;;  %v46_v18 = vld [vmem:[#allocation2 + $0xa] sm:$0x3] }
  0x19   :  { %v50_v11 = vadd.f32 %v49_v6, %v48_v4  ;;  %v57_v12 = vadd.f32 %v56_v7, %v55_v5  ;;  %v70_v16 = vrot.slane %v69_v13, 4  ;;  %v76_v17 = vsel %vm47_vm0, %v45_v14, 0.0  ;;  %s113_s20 = sshll.u32 %s186_s0, 4  ;;  %s114_s20 = int_to_ptr.vmem [resolvable:$true] %s113_s20 }
  0x1a   :  { %v64_v15 = vadd.f32 %v63_v9, %v62_v8  ;;  %v77_v21 = vrot.slane %v76_v17, 4  ;;  %v83_v22 = vsel %vm47_vm0, %v46_v18, 0.0  ;;  %s156_s21 = scalar_lea.vmem %s114_s20, 96  ;;  %p161_p9 = scmp.lt.s32.totalorder %s114_s20, %s114_s20 }
  0x1b   :  { %v51_v19 = vrot.slane %v50_v11, 2  ;;  %v58_v20 = vrot.slane %v57_v12, 2  ;;  %v71_v24 = vadd.f32 %v70_v16, %v69_v13  ;;  %v84_v25 = vrot.slane %v83_v22, 4  ;;  %v90_v35 = vld [vmem:[#allocation5] sm:$0x1]  ;;  %p157_p8 = scmp.ne.s32.totalorder %s114_s20, %s156_s21  ;;  %p162_p10 = scmp.lt.s32.totalorder %s156_s21, %s156_s21 }
  0x1c   :  { %v65_v23 = vrot.slane %v64_v15, 2  ;;  %v78_v28 = vadd.f32 %v77_v21, %v76_v17  ;;  %v91_v36 = vld [vmem:[#allocation5 + $0x1] sm:$0x1]  ;;  %v92_v42 = vld [vmem:[#allocation5 + $0x2] sm:$0x1] }
  0x1d   :  { %v52_v26 = vadd.f32 %v51_v19, %v50_v11  ;;  %v59_v27 = vadd.f32 %v58_v20, %v57_v12  ;;  %v72_v30 = vrot.slane %v71_v24, 2  ;;  %v85_v31 = vadd.f32 %v84_v25, %v83_v22  ;;  %v93_v49 = vld [vmem:[#allocation5 + $0x3] sm:$0x1]  ;;  %v94_v53 = vld [vmem:[#allocation5 + $0x4] sm:$0x1]  ;;  %p163_p11 = por %p162_p10, %p161_p9 }
  0x1e   :  { %v66_v29 = vadd.f32 %v65_v23, %v64_v15  ;;  %v79_v34 = vrot.slane %v78_v28, 2  ;;  %v95_v56 = vld [vmem:[#allocation5 + $0x5] sm:$0x1] }
  0x1f   :  { %v53_v32 = vrot.slane %v52_v26, 1  ;;  %v60_v33 = vrot.slane %v59_v27, 1  ;;  %v73_v38 = vadd.f32 %v72_v30, %v71_v24  ;;  %v86_v39 = vrot.slane %v85_v31, 2  ;;  %p164_p12 = pnand %p163_p11, %p157_p8 }
  0x20   :  { %v67_v37 = vrot.slane %v66_v29, 1  ;;  %v80_v43 = vadd.f32 %v79_v34, %v78_v28 }
  0x21   :  { %v54_v40 = vadd.f32 %v53_v32, %v52_v26  ;;  %v61_v41 = vadd.f32 %v60_v33, %v59_v27  ;;  %v74_v45 = vrot.slane %v73_v38, 1  ;;  %v87_v46 = vadd.f32 %v86_v39, %v85_v31 }
  0x22   :  { %v68_v44 = vadd.f32 %v67_v37, %v66_v29  ;;  %v81_v50 = vrot.slane %v80_v43, 1 }
  0x23   :  { %v96_v47 = vadd.f32 %v90_v35, %v54_v40  ;;  %v97_v48 = vadd.f32 %v91_v36, %v61_v41  ;;  %v75_v52 = vadd.f32 %v74_v45, %v73_v38  ;;  %v88_v54 = vrot.slane %v87_v46, 1 }
  0x24   :  { %v98_v51 = vadd.f32 %v92_v42, %v68_v44  ;;  %v82_v55 = vadd.f32 %v81_v50, %v80_v43 }
  0x25   :  { %102 = vst [vmem:[#allocation5] sm:$0x1] %v96_v47  ;;  %103 = vst [vmem:[#allocation5 + $0x1] sm:$0x1] %v97_v48  ;;  %v99_v57 = vadd.f32 %v93_v49, %v75_v52  ;;  %v89_v58 = vadd.f32 %v88_v54, %v87_v46 }
  0x26   :  { %104 = vst [vmem:[#allocation5 + $0x2] sm:$0x1] %v98_v51  ;;  %v100_v59 = vadd.f32 %v94_v53, %v82_v55 }
  0x27   :  { %105 = vst [vmem:[#allocation5 + $0x3] sm:$0x1] %v99_v57  ;;  %v101_v60 = vadd.f32 %v95_v56, %v89_v58 }
  0x28   :  { %106 = vst [vmem:[#allocation5 + $0x4] sm:$0x1] %v100_v59 }
  0x29   :  { %107 = vst [vmem:[#allocation5 + $0x5] sm:$0x1] %v101_v60 }
  0x2a   :  { %167 = shalt.err (!%p164_p12)
}
  0x2b   :  { %s168_s24 = scalar_lea.hbm %s230_s1, 96 }
  0x2c   :  { %p169_p13 = scmp.ne.s32.totalorder %s230_s1, %s168_s24  ;;  %p172_p0 = scmp.lt.u32.totalorder %s168_s24, %s230_s1 }
  0x2e   :  { %p174_p1 = pnand %p172_p0, %p169_p13 }
  0x30   :  { %177 = shalt.err (!%p174_p1)
}
  0x31   :  { %s187_s29 = smov 16   ;;  %s188_s30 = smov 1  }
  0x32   :  { %119 = dma.vmem_to_hbm [thread:$0]  %s114_s20, 96, %s230_s1, [#allocation4], %s187_s29, %s187_s29, %s188_s30  }
  0x33   :  { %180 = dma.done.wait [#allocation4], 96  }
  0x34   :  { %181 = vsyncadd [#allocation4], 4294967200 }
  0x35   :  { %123 = vsyncpa [#allocation3], 1 }
  0x36   :  { %124 = vsyncpa [#allocation4], 1 }

</bundles_post_ra>
